<compile_context>
chip_gen: v5e
topology: v5e:2x2
jax: 0.10.0
libtpu: 0.0.40
codegen_flags: <defaults>
</compile_context>

<pallas_src>
import functools

import jax
import jax.numpy as jnp
from jax.experimental import pallas as pl
from jax.experimental.pallas import tpu as pltpu


# ----------------------------- kernel -------------------------------------- #

def _deepsets_fused_kernel(x_ref, w_ref, b_ref, o_ref, *, activation: str,
                           compute_dtype):
    # x_ref: (TB, N*D_in)       block of flattened batch rows (x.dtype)
    # w_ref: (N*D_in, N*D_out)  fused weight, VMEM-resident (compute_dtype)
    # b_ref: (1, N*D_out)       fused (tiled) bias, f32
    # o_ref: (TB, N*D_out)      output block (x.dtype)
    x = x_ref[...].astype(compute_dtype)   # in-VMEM cast; feeds MXU natively
    z = jnp.dot(x, w_ref[...], preferred_element_type=jnp.float32)
    z = z + b_ref[...]                     # f32 bias add over the whole block

    if activation == "tanh":
        z = jnp.tanh(z)                    # EUP slot — overlaps MXU/VPU work
    elif activation == "relu":
        z = jnp.maximum(z, 0.0)
    elif activation != "id":
        raise ValueError("Invalid activation!")

    o_ref[...] = z.astype(o_ref.dtype)


# --------------------------- sizing helpers -------------------------------- #

def _vmem_budget_bytes() -> int:
    """Tile budget derived from the chip's physical VMEM (v7x: 64 MiB, v5e/v6e:
    128 MiB). Use ~1/4 of it, capped at 24 MiB, leaving headroom for Mosaic."""
    try:
        cap = int(pltpu.get_tpu_info().vmem_capacity_bytes)
    except Exception:  # query unavailable -> assume the smallest (v7x) VMEM
        cap = 64 << 20
    return min(cap // 4, 24 << 20)


def _pick_block_rows(batch: int, bytes_per_row: int, resident_bytes: int,
                     vmem_budget: int) -> int:
    """Pick TB (batch rows per block). Accounts for the resident fused weight /
    bias, keeps blocks sublane-aligned, and never lets the grid collapse to one
    block when the batch is big enough (v7x megacore + pipelining)."""
    avail = max(vmem_budget - resident_bytes, 1 << 20)
    tb = max(8, (int(avail // bytes_per_row) // 8) * 8)
    # Keep at least ~4 row blocks when possible so both v7x TensorCores get work
    # and the BlockSpec pipeline stays double-buffered.
    quarter = (batch // 4 // 8) * 8
    if quarter >= 8:
        tb = min(tb, quarter)
    if batch <= tb:
        return batch   # single full-extent block (valid even if batch % 8 != 0)
    return tb


# --------------------------- fused parameters ------------------------------ #

def make_fused_params(w_curr, b_curr, w_all, n: int,
                      compute_dtype=jnp.bfloat16):
    """Build the kron-fused weight/bias ONCE per weight update (cacheable).

    W_full[n*D_in+d, m*D_out+e] = (n==m)*w_curr[d,e] + w_all[d,e]
    b_full = tile(b_curr, n)
    Built with a single broadcasted add (no dense kron temporaries).
    """
    d_in, d_out = w_curr.shape
    eye = jnp.eye(n, dtype=jnp.float32)
    w4 = (w_all[None, None].astype(jnp.float32)
          + eye[:, :, None, None] * w_curr[None, None].astype(jnp.float32))
    w_full = (w4.transpose(0, 2, 1, 3)
                .reshape(n * d_in, n * d_out)
                .astype(compute_dtype))
    b_full = jnp.tile(b_curr.astype(jnp.float32), (n,)).reshape(1, n * d_out)
    return w_full, b_full


# ------------------------------ entry points ------------------------------- #

def deepsets_layer_fused(x, w_full, b_full, activation: str = "relu", *,
                         block_rows: int | None = None):
    """x: [B, N, D_in]; w_full: [N*D_in, N*D_out]; b_full: [1, N*D_out]."""
    B, N, D_in = x.shape
    K, M_out = w_full.shape
    assert K == N * D_in, "fused weight does not match x's set/feature dims"
    D_out = M_out // N

    x_flat = x.reshape(B, K)                       # free, contiguous reshape
    x_item = jnp.dtype(x.dtype).itemsize
    w_item = jnp.dtype(w_full.dtype).itemsize

    # Resident-weight VMEM accounting (weight kept VMEM-resident via constant
    # index_map; single-buffer it if large so it doesn't eat the tile budget).
    w_bytes = K * M_out * w_item
    b_bytes = M_out * jnp.dtype(b_full.dtype).itemsize
    weight_large = w_bytes > (2 << 20)
    w_buffers = 1 if weight_large else 2
    resident_bytes = w_buffers * w_bytes + 2 * b_bytes

    per_row = (K + M_out) * x_item * 2             # double-buffered x + out tiles
    budget = _vmem_budget_bytes()
    if block_rows is None:
        TB = _pick_block_rows(B, per_row, resident_bytes, budget)
    else:
        TB = min(block_rows, B)                    # test/tuning override

    grid = (pl.cdiv(B, TB),)                       # ragged last block -> masked

    w_spec_kwargs = {}
    if weight_large:
        # Constant index_map -> never refetched; no point double-buffering it.
        w_spec_kwargs["pipeline_mode"] = pl.Buffered(1)

    needed = resident_bytes + TB * per_row + (2 << 20)
    vmem_limit = int(min(max(32 << 20, needed), 48 << 20))

    cost = pl.CostEstimate(
        flops=2 * B * K * M_out,
        transcendentals=(B * M_out) if activation == "tanh" else 0,
        bytes_accessed=B * K * x_item + w_bytes + b_bytes + B * M_out * x_item,
    )

    kernel = functools.partial(_deepsets_fused_kernel, activation=activation,
                               compute_dtype=w_full.dtype)

    out_flat = pl.pallas_call(
        kernel,
        out_shape=jax.ShapeDtypeStruct((B, M_out), x.dtype),
        grid_spec=pltpu.PrefetchScalarGridSpec(
            num_scalar_prefetch=0,
            grid=grid,
            in_specs=[
                pl.BlockSpec((TB, K), lambda i: (i, 0)),                     # x block
                pl.BlockSpec((K, M_out), lambda i: (0, 0), **w_spec_kwargs), # weight
                pl.BlockSpec((1, M_out), lambda i: (0, 0)),                  # bias
            ],
            out_specs=pl.BlockSpec((TB, M_out), lambda i: (i, 0)),
        ),
        compiler_params=pltpu.CompilerParams(
            dimension_semantics=("parallel",),     # row blocks are independent
            vmem_limit_bytes=vmem_limit,
        ),
        cost_estimate=cost,
    )(x_flat, w_full, b_full)

    return out_flat.reshape(B, N, D_out)


def deepsets_layer(x, w_curr, b_curr, w_all, activation: str = "relu",
                   compute_dtype=jnp.bfloat16, block_rows: int | None = None):
    """Convenience wrapper: builds the fused params then calls the kernel.
    For repeated forward passes, cache make_fused_params() per weight update."""
    w_full, b_full = make_fused_params(w_curr, b_curr, w_all, x.shape[1],
                                       compute_dtype)
    return deepsets_layer_fused(x, w_full, b_full, activation,
                                block_rows=block_rows)


def deepsets_layer_ref(x, w_curr, b_curr, w_all, activation: str = "relu"):
    """Pure-JAX reference matching the PyTorch forward (high-precision matmuls)."""
    hp = jax.lax.Precision.HIGHEST
    z_curr = jnp.einsum("bnd,de->bne", x, w_curr, precision=hp) + b_curr
    z_all = jnp.einsum("bd,de->be", jnp.sum(x, axis=1), w_all, precision=hp)[:, None, :]
    z = z_curr + z_all
    if activation == "tanh":
        return jnp.tanh(z)
    if activation == "relu":
        return jnp.maximum(z, 0.0)
    return z


if __name__ == "__main__":
    # Small shapes consistent with the module: B=2 sets, N=8 elements, D_in=D_out=32.
    B, N, D_in, D_out = 2, 8, 32, 32

    key = jax.random.PRNGKey(0)
    kx, kwc, kbc, kwa = jax.random.split(key, 4)

    # Deterministic nn.Linear-style init: U(-1/sqrt(in_dims), 1/sqrt(in_dims)).
    bound = 1.0 / (D_in ** 0.5)
    x = jax.random.normal(kx, (B, N, D_in), dtype=jnp.float32)
    w_curr = jax.random.uniform(kwc, (D_in, D_out), jnp.float32, -bound, bound)
    b_curr = jax.random.uniform(kbc, (D_out,), jnp.float32, -bound, bound)
    w_all = jax.random.uniform(kwa, (D_in, D_out), jnp.float32, -bound, bound)

    for act in ("relu", "tanh", "id"):
        ref = deepsets_layer_ref(x, w_curr, b_curr, w_all, act)

        # f32 compute path: tight tolerance vs the high-precision reference.
        out = jax.block_until_ready(
            deepsets_layer(x, w_curr, b_curr, w_all, act, compute_dtype=jnp.float32))
        assert out.shape == (B, N, D_out)
        assert jnp.allclose(out, ref, atol=1e-4, rtol=1e-4), f"f32 mismatch ({act})"

        # Default bf16 compute path (MXU-native): looser tolerance.
        out_bf = jax.block_until_ready(deepsets_layer(x, w_curr, b_curr, w_all, act))
        assert out_bf.shape == (B, N, D_out)
        assert jnp.allclose(out_bf, ref, atol=3e-2, rtol=3e-2), f"bf16 mismatch ({act})"

    # Cached fused-params path (kron fusion hoisted out of the per-call path).
    w_full_c, b_full_c = make_fused_params(w_curr, b_curr, w_all, N, jnp.float32)
    out_c = jax.block_until_ready(deepsets_layer_fused(x, w_full_c, b_full_c, "relu"))
    assert jnp.allclose(out_c, deepsets_layer_ref(x, w_curr, b_curr, w_all, "relu"),
                        atol=1e-4, rtol=1e-4), "cached-params mismatch"

    # Ragged-batch path: B % TB != 0, handled by the cdiv grid + OOB write masking
    # (no explicit pad/slice HBM passes).
    B2 = 37
    x2 = jax.random.normal(kx, (B2, N, D_in), dtype=jnp.float32)
    out2 = jax.block_until_ready(
        deepsets_layer(x2, w_curr, b_curr, w_all, "tanh",
                       compute_dtype=jnp.float32, block_rows=16))
    ref2 = deepsets_layer_ref(x2, w_curr, b_curr, w_all, "tanh")
    assert out2.shape == (B2, N, D_out)
    assert jnp.allclose(out2, ref2, atol=1e-4, rtol=1e-4), "ragged-batch mismatch"

    print("KERNEL_OK")
</pallas_src>

<mosaic_0001>
module attributes {stable_mosaic.version = 11 : i64} {
  func.func @_deepsets_fused_kernel(%arg0: i32, %arg1: memref<2x256xf32, #tpu.memory_space<vmem>>, %arg2: memref<256x256xf32, #tpu.memory_space<vmem>>, %arg3: memref<1x256xf32, #tpu.memory_space<vmem>>, %arg4: memref<2x256xf32, #tpu.memory_space<vmem>>) attributes {dimension_semantics = [#tpu.dimension_semantics<parallel>], iteration_bounds = array<i64: 1>, scalar_prefetch = 0 : i64, scratch_operands = 0 : i64, tpu.core_type = #tpu.core_type<tc>, window_params = [{transform_indices = @transform_0, window_bounds = array<i64: 2, 256>}, {pipeline_mode = #tpu.pipeline_mode<synchronous>, transform_indices = @transform_1, window_bounds = array<i64: 256, 256>}, {pipeline_mode = #tpu.pipeline_mode<synchronous>, transform_indices = @transform_2, window_bounds = array<i64: 1, 256>}, {transform_indices = @transform_3, window_bounds = array<i64: 2, 256>}]} {
    %c0 = arith.constant 0 : index
    %c0_0 = arith.constant 0 : index
    %0 = vector.load %arg1[%c0, %c0_0] : memref<2x256xf32, #tpu.memory_space<vmem>>, vector<2x256xf32>
    %c0_1 = arith.constant 0 : index
    %c0_2 = arith.constant 0 : index
    %1 = vector.load %arg2[%c0_1, %c0_2] : memref<256x256xf32, #tpu.memory_space<vmem>>, vector<256x256xf32>
    %cst = arith.constant dense<0.000000e+00> : vector<2x256xf32>
    %2 = tpu.matmul %0, %1, %cst {dimension_numbers = #tpu.dot_dimension_numbers<[1], [0], [0], [1], [0, 0, 1, 1], [], []>} : vector<2x256xf32>, vector<256x256xf32>, vector<2x256xf32> -> vector<2x256xf32>
    %c0_3 = arith.constant 0 : index
    %c0_4 = arith.constant 0 : index
    %3 = vector.load %arg3[%c0_3, %c0_4] : memref<1x256xf32, #tpu.memory_space<vmem>>, vector<1x256xf32>
    %4 = vector.broadcast %3 : vector<1x256xf32> to vector<2x256xf32>
    %5 = arith.addf %2, %4 : vector<2x256xf32>
    %cst_5 = arith.constant 0.000000e+00 : f32
    %6 = vector.broadcast %cst_5 : f32 to vector<2x256xf32>
    %7 = arith.maximumf %5, %6 : vector<2x256xf32>
    %c0_6 = arith.constant 0 : index
    %c0_7 = arith.constant 0 : index
    %8 = vector.load %arg4[%c0_6, %c0_7] : memref<2x256xf32, #tpu.memory_space<vmem>>, vector<2x256xf32>
    tpu.vector_store %arg4[%c0_6, %c0_7], %7 {strides = array<i32>} : memref<2x256xf32, #tpu.memory_space<vmem>>, vector<2x256xf32>,
    return
  }
  func.func @transform_0(%arg0: i32) -> (i32, i32) {
    %c0_i32 = arith.constant 0 : i32
    %c0_i32_0 = arith.constant 0 : i32
    return %arg0, %c0_i32 : i32, i32
  }
  func.func @transform_1(%arg0: i32) -> (i32, i32) {
    %c0_i32 = arith.constant 0 : i32
    %c0_i32_0 = arith.constant 0 : i32
    %c0_i32_1 = arith.constant 0 : i32
    return %c0_i32, %c0_i32_0 : i32, i32
  }
  func.func @transform_2(%arg0: i32) -> (i32, i32) {
    %c0_i32 = arith.constant 0 : i32
    %c0_i32_0 = arith.constant 0 : i32
    %c0_i32_1 = arith.constant 0 : i32
    return %c0_i32, %c0_i32_0 : i32, i32
  }
  func.func @transform_3(%arg0: i32) -> (i32, i32) {
    %c0_i32 = arith.constant 0 : i32
    %c0_i32_0 = arith.constant 0 : i32
    return %arg0, %c0_i32 : i32, i32
  }
}

</mosaic_0001>

<bundles_post_ra>
// kernel: tpu_custom_call.1
= control target key start
LH: loop header
LB: loop body
LE: loop exit
PB: predicated region body
PF: predicated region fallthrough
CT: control target
= control target key end

     0   :  { %8 = vsyncpa [#allocation3], 0  ;;  %s388_s0 = inlined_call_operand.hbm [shape: f32[2,256], index: 0, kind: input, shape index: {}]   ;;  %s389_s1 = inlined_call_operand.hbm [shape: f32[256,256], index: 1, kind: input, shape index: {}]   ;;  %s390_s2 = inlined_call_operand.hbm [shape: f32[1,256], index: 2, kind: input, shape index: {}]   ;;  %s391_s3 = inlined_call_operand.hbm [shape: f32[2,256], index: 3, kind: output, shape index: {}]  }
   0x1   :  { %9 = vsyncpa [#allocation6], 0  ;;  %s26_s14 = sshll.u32 %s389_s1, 4  ;;  %s27_s14 = int_to_ptr.hbm [resolvable:$true] %s26_s14 }
   0x2   :  { %10 = vsyncpa [#allocation4], 0  ;;  %s350_s15 = smov [#allocation5]   ;;  %s16_s19 = sshll.u32 %s388_s0, 4  ;;  %s17_s19 = int_to_ptr.hbm [resolvable:$true] %s16_s19 }
   0x3   :  { %s28_s16 = sshll.u32 %s350_s15, 4  ;;  %s351_s20 = smov 256   ;;  %s29_s16 = int_to_ptr.vmem [resolvable:$true] %s28_s16 }
   0x4   :  { %s352_s21 = smov 16   ;;  %s353_s22 = smov [#allocation2]  }
   0x5   :  { %34 = dma.hbm_to_vmem [thread:$0]  %s27_s14, 8192, %s29_s16, [#allocation6], %s351_s20, %s351_s20, %s352_s21  }
   0x6   :  { %s18_s23 = sshll.u32 %s353_s22, 4  ;;  %s40_s26 = sshll.u32 %s390_s2, 4  ;;  %s19_s23 = int_to_ptr.vmem [resolvable:$true] %s18_s23  ;;  %s41_s26 = int_to_ptr.hbm [resolvable:$true] %s40_s26 }
   0x7   :  { %21 = dma.hbm_to_vmem [thread:$0]  %s17_s19, 64, %s19_s23, [#allocation3]  }
   0x8   :  { %s354_s1 = smov [#allocation7]  }
   0x9   :  { %s42_s27 = sshll.u32 %s354_s1, 4  ;;  %s43_s27 = int_to_ptr.vmem [resolvable:$true] %s42_s27 }
   0xa   :  { %45 = dma.hbm_to_vmem [thread:$0]  %s41_s26, 32, %s43_s27, [#allocation6]  }
   0xb   :  { %344 = dma.done.wait [#allocation3], 64  }
   0xc   :  { %345 = vsyncadd [#allocation3], 4294967232 }
   0xd   :  { %346 = dma.done.wait [#allocation6], 8224  }
   0xe   :  { %347 = vsyncadd [#allocation6], 4294959072  ;;  %v90_v0 = vld [vmem:[#allocation5 + $0xf8] sm:$0xff]  ;;  %v88_v1 = vld [vmem:[#allocation5 + $0xe8] sm:$0xff]  ;;  %s355_s0 = smov [#allocation8]   ;;  %s231_s30 = sshll.u32 %s391_s3, 4  ;;  %s232_s30 = int_to_ptr.hbm [resolvable:$true] %s231_s30 }
   0xf   :  { %v122_v2 = vld [vmem:[#allocation5 + $0x1f8] sm:$0xff]  ;;  %175 = vmatpush.msra.mxu2 %v90_v0  ;;  %v120_v3 = vld [vmem:[#allocation5 + $0x1e8] sm:$0xff]  ;;  %v89_v6 = vld [vmem:[#allocation5 + $0xf0] sm:$0xff]  ;;  %s229_s2 = sshll.u32 %s355_s0, 4  ;;  %vm220_vm0 = vcmask 1041408   ;;  %s230_s2 = int_to_ptr.vmem [resolvable:$true] %s229_s2 }
  0x10   :  { %195 = vmatpush.msra.mxu3 %v122_v2  ;;  %v86_v4 = vld [vmem:[#allocation5 + $0xd8] sm:$0xff]  ;;  %v87_v7 = vld [vmem:[#allocation5 + $0xe0] sm:$0xff]  ;;  %v121_v8 = vld [vmem:[#allocation5 + $0x1f0] sm:$0xff]  ;;  %135 = vmatpush.msra.mxu0 %v89_v6 }
  0x11   :  { %v118_v5 = vld [vmem:[#allocation5 + $0x1d8] sm:$0xff]  ;;  %176 = vmatpush.msra.mxu2 %v88_v1  ;;  %v84_v9 = vld [vmem:[#allocation5 + $0xc8] sm:$0xff]  ;;  %155 = vmatpush.msra.mxu1 %v121_v8  ;;  %v85_v11 = vld [vmem:[#allocation5 + $0xd0] sm:$0xff] }
  0x12   :  { %196 = vmatpush.msra.mxu3 %v120_v3  ;;  %v116_v10 = vld [vmem:[#allocation5 + $0x1c8] sm:$0xff]  ;;  %v119_v12 = vld [vmem:[#allocation5 + $0x1e0] sm:$0xff]  ;;  %v82_v13 = vld [vmem:[#allocation5 + $0xb8] sm:$0xff]  ;;  %136 = vmatpush.msra.mxu0 %v87_v7 }
  0x13   :  { %177 = vmatpush.msra.mxu2 %v86_v4  ;;  %v114_v14 = vld [vmem:[#allocation5 + $0x1b8] sm:$0xff]  ;;  %156 = vmatpush.msra.mxu1 %v119_v12  ;;  %v117_v15 = vld [vmem:[#allocation5 + $0x1d0] sm:$0xff]  ;;  %v83_v16 = vld [vmem:[#allocation5 + $0xc0] sm:$0xff] }
  0x14   :  { %197 = vmatpush.msra.mxu3 %v118_v5  ;;  %v115_v17 = vld [vmem:[#allocation5 + $0x1c0] sm:$0xff]  ;;  %v80_v18 = vld [vmem:[#allocation5 + $0xa8] sm:$0xff]  ;;  %137 = vmatpush.msra.mxu0 %v85_v11  ;;  %v81_v20 = vld [vmem:[#allocation5 + $0xb0] sm:$0xff] }
  0x15   :  { %178 = vmatpush.msra.mxu2 %v84_v9  ;;  %v112_v19 = vld [vmem:[#allocation5 + $0x1a8] sm:$0xff]  ;;  %157 = vmatpush.msra.mxu1 %v117_v15  ;;  %v113_v21 = vld [vmem:[#allocation5 + $0x1b0] sm:$0xff]  ;;  %v78_v22 = vld [vmem:[#allocation5 + $0x98] sm:$0xff] }
  0x16   :  { %198 = vmatpush.msra.mxu3 %v116_v10  ;;  %138 = vmatpush.msra.mxu0 %v83_v16  ;;  %v110_v23 = vld [vmem:[#allocation5 + $0x198] sm:$0xff]  ;;  %v79_v24 = vld [vmem:[#allocation5 + $0xa0] sm:$0xff]  ;;  %v76_v26 = vld [vmem:[#allocation5 + $0x88] sm:$0xff] }
  0x17   :  { %179 = vmatpush.msra.mxu2 %v82_v13  ;;  %158 = vmatpush.msra.mxu1 %v115_v17  ;;  %v111_v25 = vld [vmem:[#allocation5 + $0x1a0] sm:$0xff]  ;;  %v108_v27 = vld [vmem:[#allocation5 + $0x188] sm:$0xff]  ;;  %v77_v28 = vld [vmem:[#allocation5 + $0x90] sm:$0xff] }
  0x18   :  { %199 = vmatpush.msra.mxu3 %v114_v14  ;;  %139 = vmatpush.msra.mxu0 %v81_v20  ;;  %v109_v29 = vld [vmem:[#allocation5 + $0x190] sm:$0xff]  ;;  %v74_v30 = vld [vmem:[#allocation5 + $0x78] sm:$0xff]  ;;  %v75_v32 = vld [vmem:[#allocation5 + $0x80] sm:$0xff] }
  0x19   :  { %180 = vmatpush.msra.mxu2 %v80_v18  ;;  %159 = vmatpush.msra.mxu1 %v113_v21  ;;  %v106_v31 = vld [vmem:[#allocation5 + $0x178] sm:$0xff]  ;;  %v107_v33 = vld [vmem:[#allocation5 + $0x180] sm:$0xff]  ;;  %v72_v34 = vld [vmem:[#allocation5 + $0x68] sm:$0xff] }
  0x1a   :  { %200 = vmatpush.msra.mxu3 %v112_v19  ;;  %140 = vmatpush.msra.mxu0 %v79_v24  ;;  %v104_v35 = vld [vmem:[#allocation5 + $0x168] sm:$0xff]  ;;  %v73_v36 = vld [vmem:[#allocation5 + $0x70] sm:$0xff]  ;;  %v70_v38 = vld [vmem:[#allocation5 + $0x58] sm:$0xff] }
  0x1b   :  { %181 = vmatpush.msra.mxu2 %v78_v22  ;;  %160 = vmatpush.msra.mxu1 %v111_v25  ;;  %v105_v37 = vld [vmem:[#allocation5 + $0x170] sm:$0xff]  ;;  %v102_v39 = vld [vmem:[#allocation5 + $0x158] sm:$0xff]  ;;  %v71_v41 = vld [vmem:[#allocation5 + $0x60] sm:$0xff] }
  0x1c   :  { %201 = vmatpush.msra.mxu3 %v110_v23  ;;  %141 = vmatpush.msra.mxu0 %v77_v28  ;;  %v58_v40 = vld [vmem:[#allocation2] sm:$0xf]  ;;  %v103_v42 = vld [vmem:[#allocation5 + $0x160] sm:$0xff]  ;;  %v68_v43 = vld [vmem:[#allocation5 + $0x48] sm:$0xff] }
  0x1d   :  { %182 = vmatpush.msra.mxu2 %v76_v26  ;;  %161 = vmatpush.msra.mxu1 %v109_v29  ;;  %130 = vst [vmem:[#allocation1] ss:$4 sm:$0xff] %v58_v40  ;;  %v100_v44 = vld [vmem:[#allocation5 + $0x148] sm:$0xff]  ;;  %v69_v45 = vld [vmem:[#allocation5 + $0x50] sm:$0xff]  ;;  %v66_v47 = vld [vmem:[#allocation5 + $0x38] sm:$0xff] }
  0x1e   :  { %202 = vmatpush.msra.mxu3 %v108_v27  ;;  %142 = vmatpush.msra.mxu0 %v75_v32  ;;  %v101_v46 = vld [vmem:[#allocation5 + $0x150] sm:$0xff]  ;;  %v98_v48 = vld [vmem:[#allocation5 + $0x138] sm:$0xff]  ;;  %v67_v49 = vld [vmem:[#allocation5 + $0x40] sm:$0xff] }
  0x1f   :  { %183 = vmatpush.msra.mxu2 %v74_v30  ;;  %162 = vmatpush.msra.mxu1 %v107_v33  ;;  %v99_v50 = vld [vmem:[#allocation5 + $0x140] sm:$0xff]  ;;  %v64_v51 = vld [vmem:[#allocation5 + $0x28] sm:$0xff]  ;;  %v65_v53 = vld [vmem:[#allocation5 + $0x30] sm:$0xff] }
  0x20   :  { %203 = vmatpush.msra.mxu3 %v106_v31  ;;  %143 = vmatpush.msra.mxu0 %v73_v36  ;;  %v96_v52 = vld [vmem:[#allocation5 + $0x128] sm:$0xff]  ;;  %v97_v54 = vld [vmem:[#allocation5 + $0x130] sm:$0xff]  ;;  %v62_v55 = vld [vmem:[#allocation5 + $0x18] sm:$0xff] }
  0x21   :  { %184 = vmatpush.msra.mxu2 %v72_v34  ;;  %163 = vmatpush.msra.mxu1 %v105_v37  ;;  %v94_v56 = vld [vmem:[#allocation5 + $0x118] sm:$0xff]  ;;  %v63_v57 = vld [vmem:[#allocation5 + $0x20] sm:$0xff]  ;;  %v60_v59 = vld [vmem:[#allocation5 + $0x8] sm:$0xff] }
  0x22   :  { %204 = vmatpush.msra.mxu3 %v104_v35  ;;  %144 = vmatpush.msra.mxu0 %v71_v41  ;;  %v95_v58 = vld [vmem:[#allocation5 + $0x120] sm:$0xff]  ;;  %v92_v60 = vld [vmem:[#allocation5 + $0x108] sm:$0xff]  ;;  %v61_v63 = vld [vmem:[#allocation5 + $0x10] sm:$0xff] }
  0x23   :  { %185 = vmatpush.msra.mxu2 %v70_v38  ;;  %164 = vmatpush.msra.mxu1 %v103_v42  ;;  %v93_v0 = vld [vmem:[#allocation5 + $0x110] sm:$0xff]  ;;  %v59_v1 = vld [vmem:[#allocation5] sm:$0xff] }
  0x24   :  { %205 = vmatpush.msra.mxu3 %v102_v39  ;;  %145 = vmatpush.msra.mxu0 %v69_v45  ;;  %v131_v61 = vld.sshfl [vmem:[#allocation1] sm:$0xff pattern:$0x73625140]  ;;  %v132_v62 = vld.sshfl [vmem:[#allocation1 + $0x8] sm:$0xff pattern:$0x73625140] }
  0x25   :  { %186 = vmatpush.msra.mxu2 %v68_v43  ;;  %165 = vmatpush.msra.mxu1 %v101_v46  ;;  %v91_v2 = vld [vmem:[#allocation5 + $0x100] sm:$0xff] }
  0x26   :  { %206 = vmatpush.msra.mxu3 %v100_v44  ;;  %146 = vmatpush.msra.mxu0 %v67_v49  ;;  %v123_v3 = vld [vmem:[#allocation7] sm:$0x3] }
  0x27   :  { %187 = vmatpush.msra.mxu2 %v66_v47  ;;  %166 = vmatpush.msra.mxu1 %v99_v50  ;;  %v125_v4 = vperm.slane %v123_v3, 0  ;;  %v126_v5 = vperm.slane %v123_v3, 1 }
  0x28   :  { %207 = vmatpush.msra.mxu3 %v98_v48  ;;  %147 = vmatpush.msra.mxu0 %v65_v53 }
  0x29   :  { %188 = vmatpush.msra.mxu2 %v64_v51  ;;  %167 = vmatpush.msra.mxu1 %v97_v54 }
  0x2a   :  { %208 = vmatpush.msra.mxu3 %v96_v52  ;;  %148 = vmatpush.msra.mxu0 %v63_v57 }
  0x2b   :  { %189 = vmatpush.msra.mxu2 %v62_v55  ;;  %168 = vmatpush.msra.mxu1 %v95_v58 }
  0x2c   :  { %209 = vmatpush.msra.mxu3 %v94_v56  ;;  %149 = vmatpush.msra.mxu0 %v61_v63 }
  0x2d   :  { %190 = vmatpush.msra.mxu2 %v60_v59  ;;  %169 = vmatpush.msra.mxu1 %v93_v0 }
  0x2e   :  { %210 = vmatpush.msra.mxu3 %v92_v60  ;;  %191 = vmatmul.f32.vlgmr.msra.gmra.mxu2 %v131_v61 }
  0x2f   :  { %211 = vmatmul.f32.vlgmr.msra.gmra.mxu3 %v132_v62  ;;  %150 = vmatpush.msra.mxu0 %v59_v1 }
  0x30   :  { %170 = vmatpush.msra.mxu1 %v91_v2  ;;  %151 = vmatmul.f32.vlgmr.msra.gmra.mxu0 %v131_v61 }
  0x31   :  { %171 = vmatmul.f32.vlgmr.msra.gmra.mxu1 %v132_v62 }
  0xad   :  { %v152_v6 = vpop.f32.mrf.mxu0 }
  0xae   :  { %v172_v7 = vpop.f32.mrf.mxu1  ;;  %v153_v8 = vadd.f32 %v152_v6, %v125_v4 }
  0xb0   :  { %v173_v12 = vadd.f32 %v172_v7, %v153_v8 }
  0xb1   :  { %v192_v9 = vpop.f32.mrf.mxu2 }
  0xb2   :  { %v212_v10 = vpop.f32.mrf.mxu3  ;;  %v193_v11 = vadd.f32 %v192_v9, %v126_v5  ;;  %v215_v15 = vmax.f32 %v173_v12, 0.0 }
  0xb4   :  { %v213_v13 = vadd.f32 %v212_v10, %v193_v11 }
  0xb6   :  { %v216_v14 = vmax.f32 %v213_v13, 0.0 }
  0xb8   :  { %v219_v16 = vrot.slane %v216_v14, 6 }
  0xba   :  { %v221_v17 = vsel %vm220_vm0, %v215_v15, %v219_v16 }
  0xbb   :  { %223 = vst [vmem:[#allocation8] sm:$0xf] %v221_v17 }
  0xbc   :  { %234 = dma.vmem_to_hbm [thread:$0]  %s230_s2, 64, %s232_s30, [#allocation4]  }
  0xbd   :  { %348 = dma.done.wait [#allocation4], 64  }
  0xbe   :  { %349 = vsyncadd [#allocation4], 4294967232 }
  0xbf   :  { %239 = vsyncpa [#allocation3], 1 }
  0xc0   :  { %240 = vsyncpa [#allocation6], 1 }
  0xc1   :  { %241 = vsyncpa [#allocation4], 1 }

</bundles_post_ra>
